<compile_context>
chip_gen: v7x
topology: tpu7x:2x2x1
jax: 0.10.0
libtpu: 0.0.40
codegen_flags: <defaults>
</compile_context>

<pallas_src>
import jax
import jax.numpy as jnp
from jax.experimental import pallas as pl
from jax.experimental.pallas import tpu as pltpu

D_MODEL = 48      # input_dim (divisible by nhead=3)
DIM_FF = 128
OUT_DIM = 6
OUT_PAD = 8       # small lane pad for a clean 32 B/row store
EPS = 1e-5        # PyTorch LayerNorm default eps


def _round_up(a, m):
    return (a + m - 1) // m * m


def _bdot(a, w_bf16):
    """bf16 x bf16 MXU matmul with f32 accumulation."""
    return jnp.dot(a.astype(jnp.bfloat16), w_bf16,
                   preferred_element_type=jnp.float32)


def _ln(y, gamma, beta):
    """LayerNorm with one-pass statistics (sum + sum-of-squares)."""
    m = jnp.mean(y, axis=-1, keepdims=True)
    m2 = jnp.mean(y * y, axis=-1, keepdims=True)
    inv = jax.lax.rsqrt(m2 - m * m + EPS)
    return (y - m) * inv * gamma + beta


# -----------------------------------------------------------------------------
# Kernel
# -----------------------------------------------------------------------------
def refiner_kernel(x_ref, w48_ref, w128_ref, wfc3_ref, b_ref, out_ref):
    x = x_ref[...]                                     # [TB, 48] f32

    def brow(r, width):                                # (1, width) f32 bias row
        return b_ref[r:r + 1, 0:width]

    # ---- two post-LN nn.TransformerEncoderLayer (eval: dropout = id) ----
    for l in range(2):
        w_vo = w48_ref[:, (2 * l) * 128:(2 * l) * 128 + D_MODEL]   # [48,48] bf16
        l1_w = w48_ref[:, (2 * l + 1) * 128:(2 * l + 2) * 128]     # [48,128]
        l2_w = w128_ref[:, l * 128:l * 128 + D_MODEL]              # [128,48]
        r = 7 * l
        attn = _bdot(x, w_vo) + brow(r + 0, D_MODEL)       # fused V.O projection
        x = _ln(x + attn, brow(r + 1, D_MODEL), brow(r + 2, D_MODEL))
        h = jnp.maximum(_bdot(x, l1_w) + brow(r + 3, DIM_FF), 0.0)
        ff = _bdot(h, l2_w) + brow(r + 4, D_MODEL)
        x = _ln(x + ff, brow(r + 5, D_MODEL), brow(r + 6, D_MODEL))

    # ---- classifier: normalize (affine folded into fc1) -> 3 Linear layers ----
    m = jnp.mean(x, axis=-1, keepdims=True)
    m2 = jnp.mean(x * x, axis=-1, keepdims=True)
    x = (x - m) * jax.lax.rsqrt(m2 - m * m + EPS)
    fc1_w = w48_ref[:, 4 * 128:5 * 128]                    # [48,128] (LN-affine folded)
    fc2_w = w128_ref[:, 2 * 128:2 * 128 + 64]              # [128,64]
    h1 = jnp.maximum(_bdot(x, fc1_w) + brow(14, 128), 0.0)
    h2 = jnp.maximum(_bdot(h1, fc2_w) + brow(15, 64), 0.0)
    out_ref[...] = _bdot(h2, wfc3_ref[...]) + brow(16, OUT_PAD)


# -----------------------------------------------------------------------------
# Parameter construction (packed slabs)
# -----------------------------------------------------------------------------
def init_params(key):
    """Deterministic synthetic parameters, packed into 4 slabs:
       w48  [48, 640]  bf16: W_vo(L0) | linear1(L0) | W_vo(L1) | linear1(L1) | fc1'
       w128 [128, 384] bf16: linear2(L0) | linear2(L1) | fc2
       wfc3 [64, 8]    bf16: fc3 (zero-padded 6 -> 8 output cols)
       bias [17, 128]  f32 : one row per bias / LN vector (zero-padded to 128)
    Each weight segment is 128-lane aligned so in-kernel slices are aligned."""
    def lin(k, fi, fo):
        kw, kb = jax.random.split(k)
        w = jax.random.normal(kw, (fi, fo), jnp.float32) * (fi ** -0.5)
        b = jax.random.normal(kb, (1, fo), jnp.float32) * 0.02
        return w, b

    def pad_cols(w):
        c = w.shape[1]
        return jnp.pad(w, ((0, 0), (0, _round_up(c, 128) - c)))

    def brow(v):
        v = jnp.reshape(jnp.asarray(v, jnp.float32), (-1,))
        return jnp.pad(v, (0, 128 - v.shape[0]))

    keys = iter(jax.random.split(key, 14))
    w48_segs, w128_segs, bias_rows = [], [], []

    for _ in range(2):  # two encoder layers
        in_w, in_b = lin(next(keys), D_MODEL, 3 * D_MODEL)   # fused QKV in_proj
        o_w, o_b = lin(next(keys), D_MODEL, D_MODEL)         # attn out_proj
        v_w, v_b = in_w[:, 2 * D_MODEL:], in_b[:, 2 * D_MODEL:]   # V-only slice
        w_vo = v_w @ o_w                                     # host-side V.O fusion
        b_vo = v_b @ o_w + o_b
        l1_w, l1_b = lin(next(keys), D_MODEL, DIM_FF)
        l2_w, l2_b = lin(next(keys), DIM_FF, D_MODEL)
        k1, k2, k3, k4 = jax.random.split(next(keys), 4)
        n1_w = 1.0 + 0.1 * jax.random.normal(k1, (D_MODEL,), jnp.float32)
        n1_b = 0.05 * jax.random.normal(k2, (D_MODEL,), jnp.float32)
        n2_w = 1.0 + 0.1 * jax.random.normal(k3, (D_MODEL,), jnp.float32)
        n2_b = 0.05 * jax.random.normal(k4, (D_MODEL,), jnp.float32)
        w48_segs += [pad_cols(w_vo), pad_cols(l1_w)]
        w128_segs += [pad_cols(l2_w)]
        bias_rows += [brow(b_vo), brow(n1_w), brow(n1_b), brow(l1_b),
                      brow(l2_b), brow(n2_w), brow(n2_b)]

    # classifier
    kc1, kc2 = jax.random.split(next(keys))
    ln_w = 1.0 + 0.1 * jax.random.normal(kc1, (D_MODEL,), jnp.float32)
    ln_b = 0.05 * jax.random.normal(kc2, (D_MODEL,), jnp.float32)
    fc1_w, fc1_b = lin(next(keys), D_MODEL, 128)
    fc1_wf = ln_w[:, None] * fc1_w            # fold LN affine into fc1 (exact)
    fc1_bf = ln_b[None, :] @ fc1_w + fc1_b
    fc2_w, fc2_b = lin(next(keys), 128, 64)
    fc3_w, fc3_b = lin(next(keys), 64, OUT_DIM)
    fc3_w = jnp.pad(fc3_w, ((0, 0), (0, OUT_PAD - OUT_DIM)))
    fc3_b = jnp.pad(fc3_b, ((0, 0), (0, OUT_PAD - OUT_DIM)))

    w48_segs += [pad_cols(fc1_wf)]
    w128_segs += [pad_cols(fc2_w)]
    bias_rows += [brow(fc1_bf), brow(fc2_b), brow(fc3_b)]

    w48 = jnp.concatenate(w48_segs, axis=1).astype(jnp.bfloat16)    # [48, 640]
    w128 = jnp.concatenate(w128_segs, axis=1).astype(jnp.bfloat16)  # [128, 384]
    wfc3 = fc3_w.astype(jnp.bfloat16)                               # [64, 8]
    biases = jnp.stack(bias_rows, axis=0)                           # [17, 128] f32
    return (w48, w128, wfc3, biases)


# -----------------------------------------------------------------------------
# Wrapper
# -----------------------------------------------------------------------------
def _pick_tb(B, cap=1024):
    """Few, large, 8-aligned batch tiles (per-grid-step overhead ~0.35 us).
    Only split a single tile in two when both halves keep >= 512 rows, so the
    split can help v7x's two TensorCores but never becomes a pure serial
    overhead on single-TensorCore v5e/v6e."""
    n_tiles = pl.cdiv(B, cap)
    tb = _round_up(pl.cdiv(B, n_tiles), 8)
    if n_tiles == 1 and tb >= 1024:
        tb = _round_up(tb // 2, 8)
    return tb


def enhanced_refiner(x, packed, *, tb=None):
    """Forward pass; returns (logits, None) to match the PyTorch module."""
    w48, w128, wfc3, biases = packed
    B, D = x.shape
    assert D == D_MODEL
    if tb is None:
        tb = _pick_tb(B)
    grid_b = pl.cdiv(B, tb)
    Bp = grid_b * tb
    x_in = x if Bp == B else jnp.pad(x, ((0, Bp - B), (0, 0)))  # zero rows are LN-safe

    in_specs = [
        pl.BlockSpec((tb, D_MODEL), lambda i: (i, 0)),
        pl.BlockSpec(w48.shape, lambda i: (0, 0)),
        pl.BlockSpec(w128.shape, lambda i: (0, 0)),
        pl.BlockSpec(wfc3.shape, lambda i: (0, 0)),
        pl.BlockSpec(biases.shape, lambda i: (0, 0)),
    ]
    out_spec = pl.BlockSpec((tb, OUT_PAD), lambda i: (i, 0))

    logits_padded = pl.pallas_call(
        refiner_kernel,
        out_shape=jax.ShapeDtypeStruct((Bp, OUT_PAD), jnp.float32),
        grid_spec=pltpu.PrefetchScalarGridSpec(
            num_scalar_prefetch=0,
            grid=(grid_b,),
            in_specs=in_specs,
            out_specs=out_spec,
        ),
        compiler_params=pltpu.CompilerParams(
            dimension_semantics=("parallel",)),
    )(x_in, w48, w128, wfc3, biases)
    return logits_padded[:B, :OUT_DIM], None


# -----------------------------------------------------------------------------
# Pure-JAX reference (same packed params, same bf16 matmul math)
# -----------------------------------------------------------------------------
def _reference(x, packed):
    w48, w128, wfc3, bias = packed

    def brow(r, width):
        return bias[r:r + 1, 0:width]

    for l in range(2):
        w_vo = w48[:, (2 * l) * 128:(2 * l) * 128 + D_MODEL]
        l1_w = w48[:, (2 * l + 1) * 128:(2 * l + 2) * 128]
        l2_w = w128[:, l * 128:l * 128 + D_MODEL]
        r = 7 * l
        x = _ln(x + _bdot(x, w_vo) + brow(r, D_MODEL),
                brow(r + 1, D_MODEL), brow(r + 2, D_MODEL))
        h = jnp.maximum(_bdot(x, l1_w) + brow(r + 3, DIM_FF), 0.0)
        x = _ln(x + _bdot(h, l2_w) + brow(r + 4, D_MODEL),
                brow(r + 5, D_MODEL), brow(r + 6, D_MODEL))
    m = jnp.mean(x, axis=-1, keepdims=True)
    m2 = jnp.mean(x * x, axis=-1, keepdims=True)
    x = (x - m) * jax.lax.rsqrt(m2 - m * m + EPS)
    h1 = jnp.maximum(_bdot(x, w48[:, 4 * 128:5 * 128]) + brow(14, 128), 0.0)
    h2 = jnp.maximum(_bdot(h1, w128[:, 2 * 128:2 * 128 + 64]) + brow(15, 64), 0.0)
    return (_bdot(h2, wfc3) + brow(16, OUT_PAD))[:, :OUT_DIM]


if __name__ == "__main__":
    key = jax.random.PRNGKey(0)
    kx, kp = jax.random.split(key)
    B = 16
    x = jax.random.normal(kx, (B, D_MODEL), jnp.float32)
    packed = init_params(kp)

    logits, aux = enhanced_refiner(x, packed)
    jax.block_until_ready(logits)
    assert logits.shape == (B, OUT_DIM) and logits.dtype == jnp.float32
    assert aux is None

    ref = _reference(x, packed)
    err = float(jnp.max(jnp.abs(logits - ref)))
    assert jnp.allclose(logits, ref, atol=2e-2, rtol=2e-2), err
    print("KERNEL_OK")
</pallas_src>

<mosaic_0001>
module attributes {stable_mosaic.version = 11 : i64} {
  func.func @refiner_kernel(%arg0: i32, %arg1: memref<16x48xf32, #tpu.memory_space<vmem>>, %arg2: memref<48x640xbf16, #tpu.memory_space<vmem>>, %arg3: memref<128x384xbf16, #tpu.memory_space<vmem>>, %arg4: memref<64x8xbf16, #tpu.memory_space<vmem>>, %arg5: memref<17x128xf32, #tpu.memory_space<vmem>>, %arg6: memref<16x8xf32, #tpu.memory_space<vmem>>) attributes {dimension_semantics = [#tpu.dimension_semantics<parallel>], iteration_bounds = array<i64: 1>, scalar_prefetch = 0 : i64, scratch_operands = 0 : i64, tpu.core_type = #tpu.core_type<tc>, window_params = [{transform_indices = @transform_0, window_bounds = array<i64: 16, 48>}, {pipeline_mode = #tpu.pipeline_mode<synchronous>, transform_indices = @transform_1, window_bounds = array<i64: 48, 640>}, {pipeline_mode = #tpu.pipeline_mode<synchronous>, transform_indices = @transform_2, window_bounds = array<i64: 128, 384>}, {pipeline_mode = #tpu.pipeline_mode<synchronous>, transform_indices = @transform_3, window_bounds = array<i64: 64, 8>}, {pipeline_mode = #tpu.pipeline_mode<synchronous>, transform_indices = @transform_4, window_bounds = array<i64: 17, 128>}, {transform_indices = @transform_5, window_bounds = array<i64: 16, 8>}]} {
    %c0 = arith.constant 0 : index
    %c0_0 = arith.constant 0 : index
    %0 = vector.load %arg1[%c0, %c0_0] : memref<16x48xf32, #tpu.memory_space<vmem>>, vector<16x48xf32>
    %c0_1 = arith.constant 0 : index
    %c0_2 = arith.constant 0 : index
    %1 = vector.load %arg2[%c0_1, %c0_2] : memref<48x640xbf16, #tpu.memory_space<vmem>>, vector<48x48xbf16>
    %c0_3 = arith.constant 0 : index
    %c128 = arith.constant 128 : index
    %2 = vector.load %arg2[%c0_3, %c128] : memref<48x640xbf16, #tpu.memory_space<vmem>>, vector<48x128xbf16>
    %c0_4 = arith.constant 0 : index
    %c0_5 = arith.constant 0 : index
    %3 = vector.load %arg3[%c0_4, %c0_5] : memref<128x384xbf16, #tpu.memory_space<vmem>>, vector<128x48xbf16>
    %4 = arith.truncf %0 : vector<16x48xf32> to vector<16x48xbf16>
    %cst = arith.constant dense<0.000000e+00> : vector<16x48xf32>
    %5 = tpu.matmul %4, %1, %cst {dimension_numbers = #tpu.dot_dimension_numbers<[1], [0], [0], [1], [0, 0, 1, 1], [], []>} : vector<16x48xbf16>, vector<48x48xbf16>, vector<16x48xf32> -> vector<16x48xf32>
    %c0_6 = arith.constant 0 : index
    %c0_7 = arith.constant 0 : index
    %6 = vector.load %arg5[%c0_6, %c0_7] : memref<17x128xf32, #tpu.memory_space<vmem>>, vector<1x48xf32>
    %7 = vector.broadcast %6 : vector<1x48xf32> to vector<16x48xf32>
    %8 = arith.addf %5, %7 : vector<16x48xf32>
    %9 = arith.addf %0, %8 : vector<16x48xf32>
    %c1 = arith.constant 1 : index
    %c0_8 = arith.constant 0 : index
    %10 = vector.load %arg5[%c1, %c0_8] : memref<17x128xf32, #tpu.memory_space<vmem>>, vector<1x48xf32>
    %c2 = arith.constant 2 : index
    %c0_9 = arith.constant 0 : index
    %11 = vector.load %arg5[%c2, %c0_9] : memref<17x128xf32, #tpu.memory_space<vmem>>, vector<1x48xf32>
    %cst_10 = arith.constant dense<0.000000e+00> : vector<16xf32>
    %12 = vector.multi_reduction <add>, %9, %cst_10 [1] : vector<16x48xf32> to vector<16xf32>
    %13 = vector.shape_cast %12 : vector<16xf32> to vector<16x1xf32>
    %cst_11 = arith.constant 4.800000e+01 : f32
    %14 = vector.broadcast %cst_11 : f32 to vector<16x1xf32>
    %15 = arith.divf %13, %14 : vector<16x1xf32>
    %16 = arith.mulf %9, %9 : vector<16x48xf32>
    %cst_12 = arith.constant dense<0.000000e+00> : vector<16xf32>
    %17 = vector.multi_reduction <add>, %16, %cst_12 [1] : vector<16x48xf32> to vector<16xf32>
    %18 = vector.shape_cast %17 : vector<16xf32> to vector<16x1xf32>
    %cst_13 = arith.constant 4.800000e+01 : f32
    %19 = vector.broadcast %cst_13 : f32 to vector<16x1xf32>
    %20 = arith.divf %18, %19 : vector<16x1xf32>
    %21 = arith.mulf %15, %15 : vector<16x1xf32>
    %22 = arith.subf %20, %21 : vector<16x1xf32>
    %cst_14 = arith.constant 9.99999974E-6 : f32
    %23 = vector.broadcast %cst_14 : f32 to vector<16x1xf32>
    %24 = arith.addf %22, %23 : vector<16x1xf32>
    %25 = math.rsqrt %24 : vector<16x1xf32>
    %26 = vector.broadcast %15 : vector<16x1xf32> to vector<16x48xf32>
    %27 = arith.subf %9, %26 : vector<16x48xf32>
    %28 = vector.broadcast %25 : vector<16x1xf32> to vector<16x48xf32>
    %29 = arith.mulf %27, %28 : vector<16x48xf32>
    %30 = vector.broadcast %10 : vector<1x48xf32> to vector<16x48xf32>
    %31 = arith.mulf %29, %30 : vector<16x48xf32>
    %32 = vector.broadcast %11 : vector<1x48xf32> to vector<16x48xf32>
    %33 = arith.addf %31, %32 : vector<16x48xf32>
    %34 = arith.truncf %33 : vector<16x48xf32> to vector<16x48xbf16>
    %cst_15 = arith.constant dense<0.000000e+00> : vector<16x128xf32>
    %35 = tpu.matmul %34, %2, %cst_15 {dimension_numbers = #tpu.dot_dimension_numbers<[1], [0], [0], [1], [0, 0, 1, 1], [], []>} : vector<16x48xbf16>, vector<48x128xbf16>, vector<16x128xf32> -> vector<16x128xf32>
    %c3 = arith.constant 3 : index
    %c0_16 = arith.constant 0 : index
    %36 = vector.load %arg5[%c3, %c0_16] : memref<17x128xf32, #tpu.memory_space<vmem>>, vector<1x128xf32>
    %37 = vector.broadcast %36 : vector<1x128xf32> to vector<16x128xf32>
    %38 = arith.addf %35, %37 : vector<16x128xf32>
    %cst_17 = arith.constant 0.000000e+00 : f32
    %39 = vector.broadcast %cst_17 : f32 to vector<16x128xf32>
    %40 = arith.maximumf %38, %39 : vector<16x128xf32>
    %41 = arith.truncf %40 : vector<16x128xf32> to vector<16x128xbf16>
    %cst_18 = arith.constant dense<0.000000e+00> : vector<16x48xf32>
    %42 = tpu.matmul %41, %3, %cst_18 {dimension_numbers = #tpu.dot_dimension_numbers<[1], [0], [0], [1], [0, 0, 1, 1], [], []>} : vector<16x128xbf16>, vector<128x48xbf16>, vector<16x48xf32> -> vector<16x48xf32>
    %c4 = arith.constant 4 : index
    %c0_19 = arith.constant 0 : index
    %43 = vector.load %arg5[%c4, %c0_19] : memref<17x128xf32, #tpu.memory_space<vmem>>, vector<1x48xf32>
    %44 = vector.broadcast %43 : vector<1x48xf32> to vector<16x48xf32>
    %45 = arith.addf %42, %44 : vector<16x48xf32>
    %46 = arith.addf %33, %45 : vector<16x48xf32>
    %c5 = arith.constant 5 : index
    %c0_20 = arith.constant 0 : index
    %47 = vector.load %arg5[%c5, %c0_20] : memref<17x128xf32, #tpu.memory_space<vmem>>, vector<1x48xf32>
    %c6 = arith.constant 6 : index
    %c0_21 = arith.constant 0 : index
    %48 = vector.load %arg5[%c6, %c0_21] : memref<17x128xf32, #tpu.memory_space<vmem>>, vector<1x48xf32>
    %cst_22 = arith.constant dense<0.000000e+00> : vector<16xf32>
    %49 = vector.multi_reduction <add>, %46, %cst_22 [1] : vector<16x48xf32> to vector<16xf32>
    %50 = vector.shape_cast %49 : vector<16xf32> to vector<16x1xf32>
    %cst_23 = arith.constant 4.800000e+01 : f32
    %51 = vector.broadcast %cst_23 : f32 to vector<16x1xf32>
    %52 = arith.divf %50, %51 : vector<16x1xf32>
    %53 = arith.mulf %46, %46 : vector<16x48xf32>
    %cst_24 = arith.constant dense<0.000000e+00> : vector<16xf32>
    %54 = vector.multi_reduction <add>, %53, %cst_24 [1] : vector<16x48xf32> to vector<16xf32>
    %55 = vector.shape_cast %54 : vector<16xf32> to vector<16x1xf32>
    %cst_25 = arith.constant 4.800000e+01 : f32
    %56 = vector.broadcast %cst_25 : f32 to vector<16x1xf32>
    %57 = arith.divf %55, %56 : vector<16x1xf32>
    %58 = arith.mulf %52, %52 : vector<16x1xf32>
    %59 = arith.subf %57, %58 : vector<16x1xf32>
    %cst_26 = arith.constant 9.99999974E-6 : f32
    %60 = vector.broadcast %cst_26 : f32 to vector<16x1xf32>
    %61 = arith.addf %59, %60 : vector<16x1xf32>
    %62 = math.rsqrt %61 : vector<16x1xf32>
    %63 = vector.broadcast %52 : vector<16x1xf32> to vector<16x48xf32>
    %64 = arith.subf %46, %63 : vector<16x48xf32>
    %65 = vector.broadcast %62 : vector<16x1xf32> to vector<16x48xf32>
    %66 = arith.mulf %64, %65 : vector<16x48xf32>
    %67 = vector.broadcast %47 : vector<1x48xf32> to vector<16x48xf32>
    %68 = arith.mulf %66, %67 : vector<16x48xf32>
    %69 = vector.broadcast %48 : vector<1x48xf32> to vector<16x48xf32>
    %70 = arith.addf %68, %69 : vector<16x48xf32>
    %c0_27 = arith.constant 0 : index
    %c256 = arith.constant 256 : index
    %71 = vector.load %arg2[%c0_27, %c256] : memref<48x640xbf16, #tpu.memory_space<vmem>>, vector<48x48xbf16>
    %c0_28 = arith.constant 0 : index
    %c384 = arith.constant 384 : index
    %72 = vector.load %arg2[%c0_28, %c384] : memref<48x640xbf16, #tpu.memory_space<vmem>>, vector<48x128xbf16>
    %c0_29 = arith.constant 0 : index
    %c128_30 = arith.constant 128 : index
    %73 = vector.load %arg3[%c0_29, %c128_30] : memref<128x384xbf16, #tpu.memory_space<vmem>>, vector<128x48xbf16>
    %74 = arith.truncf %70 : vector<16x48xf32> to vector<16x48xbf16>
    %cst_31 = arith.constant dense<0.000000e+00> : vector<16x48xf32>
    %75 = tpu.matmul %74, %71, %cst_31 {dimension_numbers = #tpu.dot_dimension_numbers<[1], [0], [0], [1], [0, 0, 1, 1], [], []>} : vector<16x48xbf16>, vector<48x48xbf16>, vector<16x48xf32> -> vector<16x48xf32>
    %c7 = arith.constant 7 : index
    %c0_32 = arith.constant 0 : index
    %76 = vector.load %arg5[%c7, %c0_32] : memref<17x128xf32, #tpu.memory_space<vmem>>, vector<1x48xf32>
    %77 = vector.broadcast %76 : vector<1x48xf32> to vector<16x48xf32>
    %78 = arith.addf %75, %77 : vector<16x48xf32>
    %79 = arith.addf %70, %78 : vector<16x48xf32>
    %c8 = arith.constant 8 : index
    %c0_33 = arith.constant 0 : index
    %80 = vector.load %arg5[%c8, %c0_33] : memref<17x128xf32, #tpu.memory_space<vmem>>, vector<1x48xf32>
    %c9 = arith.constant 9 : index
    %c0_34 = arith.constant 0 : index
    %81 = vector.load %arg5[%c9, %c0_34] : memref<17x128xf32, #tpu.memory_space<vmem>>, vector<1x48xf32>
    %cst_35 = arith.constant dense<0.000000e+00> : vector<16xf32>
    %82 = vector.multi_reduction <add>, %79, %cst_35 [1] : vector<16x48xf32> to vector<16xf32>
    %83 = vector.shape_cast %82 : vector<16xf32> to vector<16x1xf32>
    %cst_36 = arith.constant 4.800000e+01 : f32
    %84 = vector.broadcast %cst_36 : f32 to vector<16x1xf32>
    %85 = arith.divf %83, %84 : vector<16x1xf32>
    %86 = arith.mulf %79, %79 : vector<16x48xf32>
    %cst_37 = arith.constant dense<0.000000e+00> : vector<16xf32>
    %87 = vector.multi_reduction <add>, %86, %cst_37 [1] : vector<16x48xf32> to vector<16xf32>
    %88 = vector.shape_cast %87 : vector<16xf32> to vector<16x1xf32>
    %cst_38 = arith.constant 4.800000e+01 : f32
    %89 = vector.broadcast %cst_38 : f32 to vector<16x1xf32>
    %90 = arith.divf %88, %89 : vector<16x1xf32>
    %91 = arith.mulf %85, %85 : vector<16x1xf32>
    %92 = arith.subf %90, %91 : vector<16x1xf32>
    %cst_39 = arith.constant 9.99999974E-6 : f32
    %93 = vector.broadcast %cst_39 : f32 to vector<16x1xf32>
    %94 = arith.addf %92, %93 : vector<16x1xf32>
    %95 = math.rsqrt %94 : vector<16x1xf32>
    %96 = vector.broadcast %85 : vector<16x1xf32> to vector<16x48xf32>
    %97 = arith.subf %79, %96 : vector<16x48xf32>
    %98 = vector.broadcast %95 : vector<16x1xf32> to vector<16x48xf32>
    %99 = arith.mulf %97, %98 : vector<16x48xf32>
    %100 = vector.broadcast %80 : vector<1x48xf32> to vector<16x48xf32>
    %101 = arith.mulf %99, %100 : vector<16x48xf32>
    %102 = vector.broadcast %81 : vector<1x48xf32> to vector<16x48xf32>
    %103 = arith.addf %101, %102 : vector<16x48xf32>
    %104 = arith.truncf %103 : vector<16x48xf32> to vector<16x48xbf16>
    %cst_40 = arith.constant dense<0.000000e+00> : vector<16x128xf32>
    %105 = tpu.matmul %104, %72, %cst_40 {dimension_numbers = #tpu.dot_dimension_numbers<[1], [0], [0], [1], [0, 0, 1, 1], [], []>} : vector<16x48xbf16>, vector<48x128xbf16>, vector<16x128xf32> -> vector<16x128xf32>
    %c10 = arith.constant 10 : index
    %c0_41 = arith.constant 0 : index
    %106 = vector.load %arg5[%c10, %c0_41] : memref<17x128xf32, #tpu.memory_space<vmem>>, vector<1x128xf32>
    %107 = vector.broadcast %106 : vector<1x128xf32> to vector<16x128xf32>
    %108 = arith.addf %105, %107 : vector<16x128xf32>
    %cst_42 = arith.constant 0.000000e+00 : f32
    %109 = vector.broadcast %cst_42 : f32 to vector<16x128xf32>
    %110 = arith.maximumf %108, %109 : vector<16x128xf32>
    %111 = arith.truncf %110 : vector<16x128xf32> to vector<16x128xbf16>
    %cst_43 = arith.constant dense<0.000000e+00> : vector<16x48xf32>
    %112 = tpu.matmul %111, %73, %cst_43 {dimension_numbers = #tpu.dot_dimension_numbers<[1], [0], [0], [1], [0, 0, 1, 1], [], []>} : vector<16x128xbf16>, vector<128x48xbf16>, vector<16x48xf32> -> vector<16x48xf32>
    %c11 = arith.constant 11 : index
    %c0_44 = arith.constant 0 : index
    %113 = vector.load %arg5[%c11, %c0_44] : memref<17x128xf32, #tpu.memory_space<vmem>>, vector<1x48xf32>
    %114 = vector.broadcast %113 : vector<1x48xf32> to vector<16x48xf32>
    %115 = arith.addf %112, %114 : vector<16x48xf32>
    %116 = arith.addf %103, %115 : vector<16x48xf32>
    %c12 = arith.constant 12 : index
    %c0_45 = arith.constant 0 : index
    %117 = vector.load %arg5[%c12, %c0_45] : memref<17x128xf32, #tpu.memory_space<vmem>>, vector<1x48xf32>
    %c13 = arith.constant 13 : index
    %c0_46 = arith.constant 0 : index
    %118 = vector.load %arg5[%c13, %c0_46] : memref<17x128xf32, #tpu.memory_space<vmem>>, vector<1x48xf32>
    %cst_47 = arith.constant dense<0.000000e+00> : vector<16xf32>
    %119 = vector.multi_reduction <add>, %116, %cst_47 [1] : vector<16x48xf32> to vector<16xf32>
    %120 = vector.shape_cast %119 : vector<16xf32> to vector<16x1xf32>
    %cst_48 = arith.constant 4.800000e+01 : f32
    %121 = vector.broadcast %cst_48 : f32 to vector<16x1xf32>
    %122 = arith.divf %120, %121 : vector<16x1xf32>
    %123 = arith.mulf %116, %116 : vector<16x48xf32>
    %cst_49 = arith.constant dense<0.000000e+00> : vector<16xf32>
    %124 = vector.multi_reduction <add>, %123, %cst_49 [1] : vector<16x48xf32> to vector<16xf32>
    %125 = vector.shape_cast %124 : vector<16xf32> to vector<16x1xf32>
    %cst_50 = arith.constant 4.800000e+01 : f32
    %126 = vector.broadcast %cst_50 : f32 to vector<16x1xf32>
    %127 = arith.divf %125, %126 : vector<16x1xf32>
    %128 = arith.mulf %122, %122 : vector<16x1xf32>
    %129 = arith.subf %127, %128 : vector<16x1xf32>
    %cst_51 = arith.constant 9.99999974E-6 : f32
    %130 = vector.broadcast %cst_51 : f32 to vector<16x1xf32>
    %131 = arith.addf %129, %130 : vector<16x1xf32>
    %132 = math.rsqrt %131 : vector<16x1xf32>
    %133 = vector.broadcast %122 : vector<16x1xf32> to vector<16x48xf32>
    %134 = arith.subf %116, %133 : vector<16x48xf32>
    %135 = vector.broadcast %132 : vector<16x1xf32> to vector<16x48xf32>
    %136 = arith.mulf %134, %135 : vector<16x48xf32>
    %137 = vector.broadcast %117 : vector<1x48xf32> to vector<16x48xf32>
    %138 = arith.mulf %136, %137 : vector<16x48xf32>
    %139 = vector.broadcast %118 : vector<1x48xf32> to vector<16x48xf32>
    %140 = arith.addf %138, %139 : vector<16x48xf32>
    %cst_52 = arith.constant dense<0.000000e+00> : vector<16xf32>
    %141 = vector.multi_reduction <add>, %140, %cst_52 [1] : vector<16x48xf32> to vector<16xf32>
    %142 = vector.shape_cast %141 : vector<16xf32> to vector<16x1xf32>
    %cst_53 = arith.constant 4.800000e+01 : f32
    %143 = vector.broadcast %cst_53 : f32 to vector<16x1xf32>
    %144 = arith.divf %142, %143 : vector<16x1xf32>
    %145 = arith.mulf %140, %140 : vector<16x48xf32>
    %cst_54 = arith.constant dense<0.000000e+00> : vector<16xf32>
    %146 = vector.multi_reduction <add>, %145, %cst_54 [1] : vector<16x48xf32> to vector<16xf32>
    %147 = vector.shape_cast %146 : vector<16xf32> to vector<16x1xf32>
    %cst_55 = arith.constant 4.800000e+01 : f32
    %148 = vector.broadcast %cst_55 : f32 to vector<16x1xf32>
    %149 = arith.divf %147, %148 : vector<16x1xf32>
    %150 = vector.broadcast %144 : vector<16x1xf32> to vector<16x48xf32>
    %151 = arith.subf %140, %150 : vector<16x48xf32>
    %152 = arith.mulf %144, %144 : vector<16x1xf32>
    %153 = arith.subf %149, %152 : vector<16x1xf32>
    %cst_56 = arith.constant 9.99999974E-6 : f32
    %154 = vector.broadcast %cst_56 : f32 to vector<16x1xf32>
    %155 = arith.addf %153, %154 : vector<16x1xf32>
    %156 = math.rsqrt %155 : vector<16x1xf32>
    %157 = vector.broadcast %156 : vector<16x1xf32> to vector<16x48xf32>
    %158 = arith.mulf %151, %157 : vector<16x48xf32>
    %c0_57 = arith.constant 0 : index
    %c512 = arith.constant 512 : index
    %159 = vector.load %arg2[%c0_57, %c512] : memref<48x640xbf16, #tpu.memory_space<vmem>>, vector<48x128xbf16>
    %c0_58 = arith.constant 0 : index
    %c256_59 = arith.constant 256 : index
    %160 = vector.load %arg3[%c0_58, %c256_59] : memref<128x384xbf16, #tpu.memory_space<vmem>>, vector<128x64xbf16>
    %161 = arith.truncf %158 : vector<16x48xf32> to vector<16x48xbf16>
    %cst_60 = arith.constant dense<0.000000e+00> : vector<16x128xf32>
    %162 = tpu.matmul %161, %159, %cst_60 {dimension_numbers = #tpu.dot_dimension_numbers<[1], [0], [0], [1], [0, 0, 1, 1], [], []>} : vector<16x48xbf16>, vector<48x128xbf16>, vector<16x128xf32> -> vector<16x128xf32>
    %c14 = arith.constant 14 : index
    %c0_61 = arith.constant 0 : index
    %163 = vector.load %arg5[%c14, %c0_61] : memref<17x128xf32, #tpu.memory_space<vmem>>, vector<1x128xf32>
    %164 = vector.broadcast %163 : vector<1x128xf32> to vector<16x128xf32>
    %165 = arith.addf %162, %164 : vector<16x128xf32>
    %cst_62 = arith.constant 0.000000e+00 : f32
    %166 = vector.broadcast %cst_62 : f32 to vector<16x128xf32>
    %167 = arith.maximumf %165, %166 : vector<16x128xf32>
    %168 = arith.truncf %167 : vector<16x128xf32> to vector<16x128xbf16>
    %cst_63 = arith.constant dense<0.000000e+00> : vector<16x64xf32>
    %169 = tpu.matmul %168, %160, %cst_63 {dimension_numbers = #tpu.dot_dimension_numbers<[1], [0], [0], [1], [0, 0, 1, 1], [], []>} : vector<16x128xbf16>, vector<128x64xbf16>, vector<16x64xf32> -> vector<16x64xf32>
    %c15 = arith.constant 15 : index
    %c0_64 = arith.constant 0 : index
    %170 = vector.load %arg5[%c15, %c0_64] : memref<17x128xf32, #tpu.memory_space<vmem>>, vector<1x64xf32>
    %171 = vector.broadcast %170 : vector<1x64xf32> to vector<16x64xf32>
    %172 = arith.addf %169, %171 : vector<16x64xf32>
    %cst_65 = arith.constant 0.000000e+00 : f32
    %173 = vector.broadcast %cst_65 : f32 to vector<16x64xf32>
    %174 = arith.maximumf %172, %173 : vector<16x64xf32>
    %c0_66 = arith.constant 0 : index
    %c0_67 = arith.constant 0 : index
    %175 = vector.load %arg4[%c0_66, %c0_67] : memref<64x8xbf16, #tpu.memory_space<vmem>>, vector<64x8xbf16>
    %176 = arith.truncf %174 : vector<16x64xf32> to vector<16x64xbf16>
    %cst_68 = arith.constant dense<0.000000e+00> : vector<16x8xf32>
    %177 = tpu.matmul %176, %175, %cst_68 {dimension_numbers = #tpu.dot_dimension_numbers<[1], [0], [0], [1], [0, 0, 1, 1], [], []>} : vector<16x64xbf16>, vector<64x8xbf16>, vector<16x8xf32> -> vector<16x8xf32>
    %c16 = arith.constant 16 : index
    %c0_69 = arith.constant 0 : index
    %178 = vector.load %arg5[%c16, %c0_69] : memref<17x128xf32, #tpu.memory_space<vmem>>, vector<1x8xf32>
    %179 = vector.broadcast %178 : vector<1x8xf32> to vector<16x8xf32>
    %180 = arith.addf %177, %179 : vector<16x8xf32>
    %c0_70 = arith.constant 0 : index
    %c0_71 = arith.constant 0 : index
    %181 = vector.load %arg6[%c0_70, %c0_71] : memref<16x8xf32, #tpu.memory_space<vmem>>, vector<16x8xf32>
    tpu.vector_store %arg6[%c0_70, %c0_71], %180 {strides = array<i32>} : memref<16x8xf32, #tpu.memory_space<vmem>>, vector<16x8xf32>,
    return
  }
  func.func @transform_0(%arg0: i32) -> (i32, i32) {
    %c0_i32 = arith.constant 0 : i32
    %c0_i32_0 = arith.constant 0 : i32
    return %arg0, %c0_i32 : i32, i32
  }
  func.func @transform_1(%arg0: i32) -> (i32, i32) {
    %c0_i32 = arith.constant 0 : i32
    %c0_i32_0 = arith.constant 0 : i32
    %c0_i32_1 = arith.constant 0 : i32
    return %c0_i32, %c0_i32_0 : i32, i32
  }
  func.func @transform_2(%arg0: i32) -> (i32, i32) {
    %c0_i32 = arith.constant 0 : i32
    %c0_i32_0 = arith.constant 0 : i32
    %c0_i32_1 = arith.constant 0 : i32
    return %c0_i32, %c0_i32_0 : i32, i32
  }
  func.func @transform_3(%arg0: i32) -> (i32, i32) {
    %c0_i32 = arith.constant 0 : i32
    %c0_i32_0 = arith.constant 0 : i32
    %c0_i32_1 = arith.constant 0 : i32
    return %c0_i32, %c0_i32_0 : i32, i32
  }
  func.func @transform_4(%arg0: i32) -> (i32, i32) {
    %c0_i32 = arith.constant 0 : i32
    %c0_i32_0 = arith.constant 0 : i32
    %c0_i32_1 = arith.constant 0 : i32
    return %c0_i32, %c0_i32_0 : i32, i32
  }
  func.func @transform_5(%arg0: i32) -> (i32, i32) {
    %c0_i32 = arith.constant 0 : i32
    %c0_i32_0 = arith.constant 0 : i32
    return %arg0, %c0_i32 : i32, i32
  }
}

</mosaic_0001>

<bundles_post_ra>
// kernel: tpu_custom_call.1
= control target key start
LH: loop header
LB: loop body
LE: loop exit
PB: predicated region body
PF: predicated region fallthrough
CT: control target
= control target key end

     0   :  { %10 = vsyncpa [#allocation3], 0  ;;  %s1652_s0 = inlined_call_operand.vmem [shape: f32[16,48], index: 0, kind: input, shape index: {}]   ;;  %s1653_s1 = inlined_call_operand.hbm [shape: bf16[48,640], index: 1, kind: input, shape index: {}]   ;;  %s1654_s2 = inlined_call_operand.hbm [shape: bf16[128,384], index: 2, kind: input, shape index: {}]   ;;  %s1655_s3 = inlined_call_operand.vmem [shape: bf16[64,8], index: 3, kind: input, shape index: {}]   ;;  %s1656_s4 = inlined_call_operand.vmem [shape: f32[17,128], index: 4, kind: input, shape index: {}]   ;;  %s1657_s5 = inlined_call_operand.vmem [shape: f32[16,8], index: 5, kind: output, shape index: {}]  }
   0x1   :  { %11 = vsyncpa [#allocation5], 0  ;;  %s1429_s18 = smov [#allocation2]   ;;  %s1381_s22 = scalar_lea.hbm %s1653_s1, 1920 }
   0x2   :  { %s19_s19 = sshll.u32 %s1429_s18, 4  ;;  %p1382_p0 = scmp.ne.s32.totalorder %s1653_s1, %s1381_s22  ;;  %s20_s19 = int_to_ptr.vmem [resolvable:$true] %s19_s19 }
   0x3   :  { %p1385_p1 = scmp.lt.u32.totalorder %s1381_s22, %s1653_s1 }
   0x5   :  { %p1387_p2 = pnand %p1385_p1, %p1382_p0 }
   0x7   :  { %1390 = shalt.err (!%p1387_p2)
}
   0x8   :  { %s1391_s27 = scalar_lea.vmem %s20_s19, 1920  ;;  %p1396_p4 = scmp.lt.s32.totalorder %s20_s19, %s20_s19 }
   0x9   :  { %p1392_p3 = scmp.ne.s32.totalorder %s20_s19, %s1391_s27  ;;  %p1397_p5 = scmp.lt.s32.totalorder %s1391_s27, %s1391_s27 }
   0xb   :  { %p1398_p6 = por %p1397_p5, %p1396_p4 }
   0xd   :  { %p1399_p7 = pnand %p1398_p6, %p1392_p3 }
   0xf   :  { %1402 = shalt.err (!%p1399_p7)
}
  0x10   :  { %s1430_s28 = smov 320   ;;  %s1431_s29 = smov 20  }
  0x11   :  { %25 = dma.hbm_to_vmem [thread:$0]  %s1653_s1, 1920, %s20_s19, [#allocation3], %s1430_s28, %s1430_s28, %s1431_s29  }
  0x12   :  { %s1432_s7 = smov [#allocation4]   ;;  %s1403_s11 = scalar_lea.hbm %s1654_s2, 3072 }
  0x13   :  { %s31_s8 = sshll.u32 %s1432_s7, 4  ;;  %p1404_p8 = scmp.ne.s32.totalorder %s1654_s2, %s1403_s11  ;;  %s32_s8 = int_to_ptr.vmem [resolvable:$true] %s31_s8 }
  0x14   :  { %p1407_p9 = scmp.lt.u32.totalorder %s1403_s11, %s1654_s2 }
  0x16   :  { %p1409_p10 = pnand %p1407_p9, %p1404_p8 }
  0x18   :  { %1412 = shalt.err (!%p1409_p10)
}
  0x19   :  { %s1413_s16 = scalar_lea.vmem %s32_s8, 3072  ;;  %p1418_p12 = scmp.lt.s32.totalorder %s32_s8, %s32_s8 }
  0x1a   :  { %p1414_p11 = scmp.ne.s32.totalorder %s32_s8, %s1413_s16  ;;  %p1419_p13 = scmp.lt.s32.totalorder %s1413_s16, %s1413_s16 }
  0x1c   :  { %p1420_p0 = por %p1419_p13, %p1418_p12 }
  0x1e   :  { %p1421_p1 = pnand %p1420_p0, %p1414_p11 }
  0x20   :  { %1424 = shalt.err (!%p1421_p1)
}
  0x21   :  { %s1433_s1 = smov 192   ;;  %s1434_s17 = smov 12  }
  0x22   :  { %37 = dma.hbm_to_vmem [thread:$0]  %s1654_s2, 3072, %s32_s8, [#allocation5], %s1433_s1, %s1433_s1, %s1434_s17  }
  0x23   :  { %1425 = dma.done.wait [#allocation3], 1920  }
  0x24   :  { %1426 = vsyncadd [#allocation3], 4294965376 }
  0x25   :  { %1427 = dma.done.wait [#allocation5], 3072  }
  0x26   :  { %1428 = vsyncadd [#allocation5], 4294964224  ;;  %v1435_v0 = vmov 0.0   ;;  %vm1436_vm0 = vmmov 0   ;;  %v1318_v1 = vld [vmem:[#allocation2] ss:$20 sps:$4 sm:$0xff]  }
  0x27   :  { %1188 = vmatprep.subr.bf16.mxu0 %v1435_v0  ;;  %1194 = vmatprep.mubr.msk.bf16.mxu0 %vm1436_vm0, %v1435_v0  ;;  %v1319_v2 = vld [vmem:[#allocation2 + $0x28] ss:$20 sps:$4 sm:$0xff]   ;;  %vm103_vm1 = vcmask 392192   ;;  %v1320_v3 = vld [vmem:[#allocation2 + $0x50] ss:$20 sps:$4 sm:$0xff]   ;;  %vm1016_vm2 = vcmask 523264  }
  0x28   :  { %1198 = vmatprep.subr.bf16.mxu1 %v1435_v0  ;;  %1204 = vmatprep.mubr.msk.bf16.mxu1 %vm1436_vm0, %v1435_v0  ;;  %v49_v4 = vld [vmem:[%s1652_s0] sm:$0xff]  ;;  %v50_v5 = vld [vmem:[%s1652_s0 + $0x8] sm:$0xff]  ;;  %v1325_v26 = vld [vmem:[#allocation4 + $0x18] ss:$12 sps:$4 sm:$0xff]   ;;  %vm1061_vm3 = vcmask 64512  }
  0x29   :  { %1189 = vmatpush3.bf16.msra.mxu0 %v1318_v1  ;;  %v79_v6 = vpack.c.bf16 %v50_v5, %v49_v4  ;;  %v1070_v7 = vld [vmem:[%s1656_s4] ss:$0 sm:$0xff]  ;;  %v1321_v22 = vld [vmem:[#allocation2 + $0x4] ss:$20 sps:$4 sm:$0xff]   ;;  %v1323_v24 = vld [vmem:[#allocation2 + $0x54] ss:$20 sps:$4 sm:$0xff]  }
  0x2a   :  { %1190 = vmatprep.subr.bf16.mxu0 %v1435_v0  ;;  %1199 = vmatpush3.bf16.msra.mxu1 %v1321_v22  ;;  %v1322_v23 = vld [vmem:[#allocation2 + $0x2c] ss:$20 sps:$4 sm:$0xff]   ;;  %v1324_v25 = vld [vmem:[#allocation4] ss:$12 sps:$4 sm:$0xff]   ;;  %v1326_v27 = vld [vmem:[#allocation4 + $0x30] ss:$12 sps:$4 sm:$0xff]  }
  0x2b   :  { %1200 = vmatprep.subr.bf16.mxu1 %v1435_v0  ;;  %v1327_v28 = vld [vmem:[#allocation4 + $0x48] ss:$12 sps:$4 sm:$0xff]   ;;  %v1328_v29 = vld [vmem:[#allocation4 + $0x60] ss:$12 sps:$4 sm:$0xff]   ;;  %v1329_v30 = vld [vmem:[#allocation4 + $0x78] ss:$12 sps:$4 sm:$0xff]  }
  0x2c   :  { %v1075_v48 = vld [vmem:[%s1656_s4 + $0x1] ss:$0 sm:$0xff]  ;;  %v1076_v53 = vld [vmem:[%s1656_s4 + $0x2] ss:$0 sm:$0xff]  ;;  %v1330_v58 = vld [vmem:[#allocation4 + $0x90] ss:$12 sps:$4 sm:$0xff]  }
  0x2d   :  { %1191 = vmatpush3.bf16.msra.mxu0 %v1319_v2  ;;  %v1331_v59 = vld [vmem:[#allocation4 + $0xa8] ss:$12 sps:$4 sm:$0xff]   ;;  %v1332_v22 = vld [vmem:[#allocation2 + $0x8] ss:$20 sps:$4 sm:$0xff]  }
  0x2e   :  { %1192 = vmatprep.subr.bf16.mxu0 %v1435_v0  ;;  %1201 = vmatpush3.bf16.msra.mxu1 %v1322_v23  ;;  %v1077_v60 = vld [vmem:[%s1656_s4 + $0x3] ss:$0 sm:$0xff]  ;;  %v1333_v23 = vld [vmem:[#allocation2 + $0x30] ss:$20 sps:$4 sm:$0xff]  }
  0x2f   :  { %1202 = vmatprep.subr.bf16.mxu1 %v1435_v0 }
  0x31   :  { %1193 = vmatpush3.bf16.msra.mxu0 %v1320_v3 }
  0x32   :  { %1208 = vmatprep.subr.bf16.mxu0 %v1435_v0  ;;  %1203 = vmatpush3.bf16.msra.mxu1 %v1323_v24  ;;  %v1334_v24 = vld [vmem:[#allocation2 + $0x58] ss:$20 sps:$4 sm:$0xff]  }
  0x33   :  { %1228 = vmatprep.subr.bf16.mxu1 %v1435_v0 }
  0x34   :  { %1195 = vmatmul.mubr.msk.bf16.vlgmr.msra.gmra.mrb[0].mxu0 %vm103_vm1, %v79_v6 }
  0x35   :  { %1224 = vmatprep.mubr.msk.bf16.mxu0 %vm1436_vm0, %v1435_v0  ;;  %1209 = vmatpush3.bf16.msra.mxu0 %v1324_v25 }
  0x36   :  { %1210 = vmatprep.subr.bf16.mxu0 %v1435_v0 }
  0x39   :  { %1211 = vmatpush3.bf16.msra.mxu0 %v1325_v26 }
  0x3a   :  { %1212 = vmatprep.subr.bf16.mxu0 %v1435_v0 }
  0x3d   :  { %1213 = vmatpush3.bf16.msra.mxu0 %v1326_v27 }
  0x3e   :  { %1214 = vmatprep.subr.bf16.mxu0 %v1435_v0 }
  0x41   :  { %1215 = vmatpush3.bf16.msra.mxu0 %v1327_v28 }
  0x42   :  { %1216 = vmatprep.subr.bf16.mxu0 %v1435_v0 }
  0x45   :  { %1217 = vmatpush3.bf16.msra.mxu0 %v1328_v29 }
  0x46   :  { %1218 = vmatprep.subr.bf16.mxu0 %v1435_v0 }
  0x49   :  { %1219 = vmatpush3.bf16.msra.mxu0 %v1329_v30 }
  0x4a   :  { %1220 = vmatprep.subr.bf16.mxu0 %v1435_v0 }
  0x4d   :  { %1221 = vmatpush3.bf16.msra.mxu0 %v1330_v58 }
  0x4e   :  { %1222 = vmatprep.subr.bf16.mxu0 %v1435_v0 }
  0x51   :  { %1223 = vmatpush3.bf16.msra.mxu0 %v1331_v59 }
  0x52   :  { %1268 = vmatprep.subr.bf16.mxu0 %v1435_v0 }
 0x107   :  { %v141_v8 = vpop.f32.mrb[0].mxu0 }
 0x108   :  { %v142_v9 = vadd.f32 %v1070_v7, %v141_v8  ;;  %v1196_v10 = vpop.f32.mrb[1].mxu0 }
 0x109   :  { %v144_v11 = vpop.f32.mrb[2].mxu0 }
 0x10a   :  { %v148_v12 = vadd.f32 %v142_v9, %v49_v4  ;;  %v145_v13 = vadd.f32 %v1070_v7, %v144_v11  ;;  %v1197_v14 = vpop.f32.mrb[3].mxu0  ;;  %v1082_v7 = vld [vmem:[%s1656_s4 + $0x4] ss:$0 sm:$0xff] }
 0x10c   :  { %v149_v15 = vadd.f32 %v145_v13, %v50_v5  ;;  %v152_v16 = vsel %vm103_vm1, %v148_v12, 0.0  ;;  %v161_v17 = vmul.f32 %v148_v12, %v148_v12 }
 0x10d   :  { %153 = vadd.xlane.f32.xlu0 %v152_v16 }
 0x10e   :  { %v163_v18 = vsel %vm103_vm1, %v161_v17, 0.0  ;;  %v162_v19 = vmul.f32 %v149_v15, %v149_v15  ;;  %v155_v20 = vsel %vm103_vm1, %v149_v15, 0.0 }
 0x10f   :  { %164 = vadd.xlane.f32.xlu1 %v163_v18 }
 0x110   :  { %v166_v21 = vsel %vm103_vm1, %v162_v19, 0.0 }
 0x111   :  { %156 = vadd.xlane.f32.xlu0 %v155_v20 }
 0x113   :  { %167 = vadd.xlane.f32.xlu1 %v166_v21 }
 0x19a   :  { %v154_v31 = vpop.xlane.xlu0 %153 }
 0x19b   :  { %v159_v32 = vmul.f32 0.020833334, %v154_v31 }
 0x19c   :  { %v165_v33 = vpop.xlane.xlu1 %164 }
 0x19d   :  { %v171_v34 = vmul.f32 %v159_v32, %v159_v32  ;;  %v169_v35 = vmul.f32 0.020833334, %v165_v33  ;;  %v179_v45 = vsub.f32 %v148_v12, %v159_v32 }
 0x19e   :  { %v157_v36 = vpop.xlane.xlu0 %156 }
 0x19f   :  { %v173_v37 = vsub.f32 %v169_v35, %v171_v34  ;;  %v160_v38 = vmul.f32 0.020833334, %v157_v36 }
 0x1a0   :  { %v168_v39 = vpop.xlane.xlu1 %167 }
 0x1a1   :  { %v175_v40 = vadd.f32 1e-05, %v173_v37  ;;  %v172_v41 = vmul.f32 %v160_v38, %v160_v38  ;;  %v170_v42 = vmul.f32 0.020833334, %v168_v39  ;;  %v180_v49 = vsub.f32 %v149_v15, %v160_v38 }
 0x1a3   :  { %1361 = vrsqrt.f32 %v175_v40  ;;  %v174_v43 = vsub.f32 %v170_v42, %v172_v41  ;;  %v1091_v41 = vld [vmem:[%s1656_s4 + $0x5] ss:$0 sm:$0xff] }
 0x1a5   :  { %v176_v44 = vadd.f32 1e-05, %v174_v43 }
 0x1a7   :  { %1363 = vrsqrt.f32 %v176_v44 }
 0x1ad   :  { %v1362_v46 = vpop.eup %1361 }
 0x1ae   :  { %v181_v47 = vmul.f32 %v1362_v46, %v179_v45 }
 0x1b0   :  { %v187_v52 = vmul.f32 %v1075_v48, %v181_v47  ;;  %v1092_v47 = vld [vmem:[%s1656_s4 + $0x6] ss:$0 sm:$0xff] }
 0x1b1   :  { %v1364_v50 = vpop.eup %1363 }
 0x1b2   :  { %v182_v51 = vmul.f32 %v1364_v50, %v180_v49  ;;  %v193_v55 = vadd.f32 %v1076_v53, %v187_v52  ;;  %v1093_v52 = vld [vmem:[%s1656_s4 + $0x7] ss:$0 sm:$0xff] }
 0x1b4   :  { %v188_v54 = vmul.f32 %v1075_v48, %v182_v51 }
 0x1b6   :  { %v194_v56 = vadd.f32 %v1076_v53, %v188_v54 }
 0x1b8   :  { %v195_v57 = vpack.c.bf16 %v194_v56, %v193_v55 }
 0x1ba   :  { %1205 = vmatmul.mubr.msk.bf16.vlgmr.msra.gmra.mrb[0].mxu1 %vm103_vm1, %v195_v57 }
 0x1bb   :  { %1234 = vmatprep.mubr.msk.bf16.mxu1 %vm1436_vm0, %v1435_v0  ;;  %1229 = vmatpush3.bf16.msra.mxu1 %v1332_v22 }
 0x1bc   :  { %1230 = vmatprep.subr.bf16.mxu1 %v1435_v0 }
 0x1bf   :  { %1231 = vmatpush3.bf16.msra.mxu1 %v1333_v23  ;;  %v1098_v23 = vld [vmem:[%s1656_s4 + $0x8] ss:$0 sm:$0xff] }
 0x1c0   :  { %1232 = vmatprep.subr.bf16.mxu1 %v1435_v0 }
 0x1c3   :  { %1233 = vmatpush3.bf16.msra.mxu1 %v1334_v24 }
 0x1c4   :  { %1238 = vmatprep.subr.bf16.mxu1 %v1435_v0 }
 0x28d   :  { %v256_v61 = vpop.f32.mrb[0].mxu1 }
 0x28e   :  { %v257_v62 = vadd.f32 %v1077_v60, %v256_v61  ;;  %v1206_v63 = vpop.f32.mrb[1].mxu1 }
 0x28f   :  { %v259_v1 = vpop.f32.mrb[2].mxu1 }
 0x290   :  { %v260_v2 = vadd.f32 %v1077_v60, %v259_v1  ;;  %v1207_v3 = vpop.f32.mrb[3].mxu1  ;;  %v263_v4 = vmax.f32 %v257_v62, 0.0 }
 0x292   :  { %v264_v5 = vmax.f32 %v260_v2, 0.0 }
 0x294   :  { %v265_v6 = vpack.c.bf16 %v264_v5, %v263_v4  ;;  %v1335_v4 = vld [vmem:[#allocation2 + $0xc] ss:$20 sps:$4 sm:$0xff]   ;;  %v1336_v5 = vld [vmem:[#allocation2 + $0x34] ss:$20 sps:$4 sm:$0xff]  }
 0x296   :  { %1225 = vmatmul.mubr.bf16.vlgmr.msra.gmra.mrb[4].mxu0 %v265_v6  ;;  %v1337_v6 = vld [vmem:[#allocation2 + $0x5c] ss:$20 sps:$4 sm:$0xff]  }
 0x297   :  { %1274 = vmatprep.mubr.msk.bf16.mxu0 %vm1436_vm0, %v1435_v0 }
 0x369   :  { %v353_v8 = vpop.f32.mrb[4].mxu0 }
 0x36a   :  { %v354_v9 = vadd.f32 %v1082_v7, %v353_v8  ;;  %v1226_v10 = vpop.f32.mrb[5].mxu0 }
 0x36b   :  { %v356_v11 = vpop.f32.mrb[6].mxu0 }
 0x36c   :  { %v360_v12 = vadd.f32 %v354_v9, %v193_v55  ;;  %v357_v13 = vadd.f32 %v1082_v7, %v356_v11  ;;  %v1227_v14 = vpop.f32.mrb[7].mxu0 }
 0x36e   :  { %v361_v15 = vadd.f32 %v357_v13, %v194_v56  ;;  %v364_v16 = vsel %vm103_vm1, %v360_v12, 0.0  ;;  %v372_v17 = vmul.f32 %v360_v12, %v360_v12 }
 0x36f   :  { %365 = vadd.xlane.f32.xlu0 %v364_v16 }
 0x370   :  { %v367_v18 = vsel %vm103_vm1, %v361_v15, 0.0  ;;  %v373_v19 = vmul.f32 %v361_v15, %v361_v15  ;;  %v374_v20 = vsel %vm103_vm1, %v372_v17, 0.0 }
 0x371   :  { %368 = vadd.xlane.f32.xlu1 %v367_v18 }
 0x372   :  { %v377_v21 = vsel %vm103_vm1, %v373_v19, 0.0 }
 0x373   :  { %375 = vadd.xlane.f32.xlu0 %v374_v20 }
 0x375   :  { %378 = vadd.xlane.f32.xlu1 %v377_v21 }
 0x3fc   :  { %v366_v25 = vpop.xlane.xlu0 %365 }
 0x3fd   :  { %v370_v26 = vmul.f32 0.020833334, %v366_v25 }
 0x3fe   :  { %v369_v27 = vpop.xlane.xlu1 %368 }
 0x3ff   :  { %v371_v28 = vmul.f32 0.020833334, %v369_v27  ;;  %v382_v30 = vmul.f32 %v370_v26, %v370_v26  ;;  %v390_v39 = vsub.f32 %v360_v12, %v370_v26 }
 0x400   :  { %v376_v29 = vpop.xlane.xlu0 %375 }
 0x401   :  { %v380_v31 = vmul.f32 0.020833334, %v376_v29  ;;  %v383_v33 = vmul.f32 %v371_v28, %v371_v28  ;;  %v391_v42 = vsub.f32 %v361_v15, %v371_v28  ;;  %v1099_v29 = vld [vmem:[%s1656_s4 + $0x9] ss:$0 sm:$0xff] }
 0x402   :  { %v379_v32 = vpop.xlane.xlu1 %378 }
 0x403   :  { %v384_v34 = vsub.f32 %v380_v31, %v382_v30  ;;  %v381_v35 = vmul.f32 0.020833334, %v379_v32 }
 0x405   :  { %v386_v36 = vadd.f32 1e-05, %v384_v34  ;;  %v385_v37 = vsub.f32 %v381_v35, %v383_v33  ;;  %v1338_v33 = vld [vmem:[#allocation4 + $0x4] ss:$12 sps:$4 sm:$0xff]   ;;  %v1339_v35 = vld [vmem:[#allocation4 + $0x1c] ss:$12 sps:$4 sm:$0xff]  }
 0x407   :  { %1365 = vrsqrt.f32 %v386_v36  ;;  %v387_v38 = vadd.f32 1e-05, %v385_v37  ;;  %v1340_v36 = vld [vmem:[#allocation4 + $0x34] ss:$12 sps:$4 sm:$0xff]   ;;  %v1341_v37 = vld [vmem:[#allocation4 + $0x4c] ss:$12 sps:$4 sm:$0xff]  }
 0x409   :  { %1367 = vrsqrt.f32 %v387_v38  ;;  %v1342_v38 = vld [vmem:[#allocation4 + $0x64] ss:$12 sps:$4 sm:$0xff]  }
 0x411   :  { %v1366_v40 = vpop.eup %1365 }
 0x412   :  { %v392_v43 = vmul.f32 %v1366_v40, %v390_v39  ;;  %v1343_v39 = vld [vmem:[#allocation4 + $0x7c] ss:$12 sps:$4 sm:$0xff]   ;;  %v1344_v40 = vld [vmem:[#allocation4 + $0x94] ss:$12 sps:$4 sm:$0xff]  }
 0x413   :  { %v1368_v44 = vpop.eup %1367 }
 0x414   :  { %v393_v45 = vmul.f32 %v1368_v44, %v391_v42  ;;  %v398_v46 = vmul.f32 %v1091_v41, %v392_v43  ;;  %v1100_v42 = vld [vmem:[%s1656_s4 + $0xa] ss:$0 sm:$0xff] }
 0x416   :  { %v399_v48 = vmul.f32 %v1091_v41, %v393_v45  ;;  %v404_v49 = vadd.f32 %v1092_v47, %v398_v46  ;;  %v1345_v41 = vld [vmem:[#allocation4 + $0xac] ss:$12 sps:$4 sm:$0xff]  }
 0x418   :  { %v405_v50 = vadd.f32 %v1092_v47, %v399_v48 }
 0x41a   :  { %v434_v51 = vpack.c.bf16 %v405_v50, %v404_v49 }
 0x41c   :  { %1235 = vmatmul.mubr.msk.bf16.vlgmr.msra.gmra.mrb[4].mxu1 %vm103_vm1, %v434_v51 }
 0x41d   :  { %1244 = vmatprep.mubr.msk.bf16.mxu1 %vm1436_vm0, %v1435_v0  ;;  %1239 = vmatpush3.bf16.msra.mxu1 %v1335_v4 }
 0x41e   :  { %1240 = vmatprep.subr.bf16.mxu1 %v1435_v0 }
 0x421   :  { %1241 = vmatpush3.bf16.msra.mxu1 %v1336_v5 }
 0x422   :  { %1242 = vmatprep.subr.bf16.mxu1 %v1435_v0 }
 0x425   :  { %1243 = vmatpush3.bf16.msra.mxu1 %v1337_v6 }
 0x426   :  { %1248 = vmatprep.subr.bf16.mxu1 %v1435_v0 }
 0x4ef   :  { %v495_v53 = vpop.f32.mrb[4].mxu1 }
 0x4f0   :  { %v496_v54 = vadd.f32 %v1093_v52, %v495_v53  ;;  %v1236_v55 = vpop.f32.mrb[5].mxu1 }
 0x4f1   :  { %v498_v56 = vpop.f32.mrb[6].mxu1 }
 0x4f2   :  { %v502_v57 = vadd.f32 %v496_v54, %v404_v49  ;;  %v499_v58 = vadd.f32 %v1093_v52, %v498_v56  ;;  %v1237_v59 = vpop.f32.mrb[7].mxu1  ;;  %v1105_v52 = vld [vmem:[%s1656_s4 + $0xb] ss:$0 sm:$0xff] }
 0x4f4   :  { %v503_v60 = vadd.f32 %v499_v58, %v405_v50  ;;  %v506_v61 = vsel %vm103_vm1, %v502_v57, 0.0  ;;  %v514_v62 = vmul.f32 %v502_v57, %v502_v57 }
 0x4f5   :  { %507 = vadd.xlane.f32.xlu0 %v506_v61 }
 0x4f6   :  { %v509_v63 = vsel %vm103_vm1, %v503_v60, 0.0  ;;  %v515_v1 = vmul.f32 %v503_v60, %v503_v60  ;;  %v516_v2 = vsel %vm103_vm1, %v514_v62, 0.0 }
 0x4f7   :  { %510 = vadd.xlane.f32.xlu1 %v509_v63 }
 0x4f8   :  { %v519_v3 = vsel %vm103_vm1, %v515_v1, 0.0 }
 0x4f9   :  { %517 = vadd.xlane.f32.xlu0 %v516_v2 }
 0x4fb   :  { %520 = vadd.xlane.f32.xlu1 %v519_v3 }
 0x582   :  { %v508_v7 = vpop.xlane.xlu0 %507 }
 0x583   :  { %v512_v8 = vmul.f32 0.020833334, %v508_v7 }
 0x584   :  { %v511_v9 = vpop.xlane.xlu1 %510 }
 0x585   :  { %v513_v10 = vmul.f32 0.020833334, %v511_v9  ;;  %v524_v12 = vmul.f32 %v512_v8, %v512_v8  ;;  %v532_v21 = vsub.f32 %v502_v57, %v512_v8 }
 0x586   :  { %v518_v11 = vpop.xlane.xlu0 %517 }
 0x587   :  { %v522_v13 = vmul.f32 0.020833334, %v518_v11  ;;  %v525_v15 = vmul.f32 %v513_v10, %v513_v10  ;;  %v533_v24 = vsub.f32 %v503_v60, %v513_v10 }
 0x588   :  { %v521_v14 = vpop.xlane.xlu1 %520 }
 0x589   :  { %v526_v16 = vsub.f32 %v522_v13, %v524_v12  ;;  %v523_v17 = vmul.f32 0.020833334, %v521_v14 }
 0x58b   :  { %v528_v18 = vadd.f32 1e-05, %v526_v16  ;;  %v527_v19 = vsub.f32 %v523_v17, %v525_v15 }
 0x58d   :  { %1369 = vrsqrt.f32 %v528_v18  ;;  %v529_v20 = vadd.f32 1e-05, %v527_v19 }
 0x58f   :  { %1371 = vrsqrt.f32 %v529_v20  ;;  %v1114_v20 = vld [vmem:[%s1656_s4 + $0xc] ss:$0 sm:$0xff] }
 0x597   :  { %v1370_v22 = vpop.eup %1369 }
 0x598   :  { %v534_v25 = vmul.f32 %v1370_v22, %v532_v21 }
 0x599   :  { %v1372_v26 = vpop.eup %1371 }
 0x59a   :  { %v535_v27 = vmul.f32 %v1372_v26, %v533_v24  ;;  %v540_v28 = vmul.f32 %v1098_v23, %v534_v25  ;;  %v1115_v24 = vld [vmem:[%s1656_s4 + $0xd] ss:$0 sm:$0xff] }
 0x59c   :  { %v541_v30 = vmul.f32 %v1098_v23, %v535_v27  ;;  %v546_v31 = vadd.f32 %v1099_v29, %v540_v28 }
 0x59e   :  { %v547_v32 = vadd.f32 %v1099_v29, %v541_v30 }
 0x5a0   :  { %v548_v34 = vpack.c.bf16 %v547_v32, %v546_v31 }
 0x5a2   :  { %1245 = vmatmul.mubr.msk.bf16.vlgmr.msra.gmra.mrb[8].mxu1 %vm103_vm1, %v548_v34 }
 0x5a3   :  { %1249 = vmatpush3.bf16.msra.mxu1 %v1338_v33  ;;  %1264 = vmatprep.mubr.msk.bf16.mxu1 %vm1436_vm0, %v1435_v0 }
 0x5a4   :  { %1250 = vmatprep.subr.bf16.mxu1 %v1435_v0 }
 0x5a7   :  { %1251 = vmatpush3.bf16.msra.mxu1 %v1339_v35 }
 0x5a8   :  { %1252 = vmatprep.subr.bf16.mxu1 %v1435_v0 }
 0x5ab   :  { %1253 = vmatpush3.bf16.msra.mxu1 %v1340_v36  ;;  %v1346_v36 = vld [vmem:[#allocation2 + $0x10] ss:$20 sps:$4 sm:$0xff]  }
 0x5ac   :  { %1254 = vmatprep.subr.bf16.mxu1 %v1435_v0  ;;  %1269 = vmatpush3.bf16.msra.mxu0 %v1346_v36 }
 0x5ad   :  { %1270 = vmatprep.subr.bf16.mxu0 %v1435_v0 }
 0x5af   :  { %1255 = vmatpush3.bf16.msra.mxu1 %v1341_v37  ;;  %v1347_v37 = vld [vmem:[#allocation2 + $0x38] ss:$20 sps:$4 sm:$0xff]  }
 0x5b0   :  { %1256 = vmatprep.subr.bf16.mxu1 %v1435_v0  ;;  %1271 = vmatpush3.bf16.msra.mxu0 %v1347_v37 }
 0x5b1   :  { %1272 = vmatprep.subr.bf16.mxu0 %v1435_v0 }
 0x5b3   :  { %1257 = vmatpush3.bf16.msra.mxu1 %v1342_v38  ;;  %v1348_v38 = vld [vmem:[#allocation2 + $0x60] ss:$20 sps:$4 sm:$0xff]  }
 0x5b4   :  { %1258 = vmatprep.subr.bf16.mxu1 %v1435_v0  ;;  %1273 = vmatpush3.bf16.msra.mxu0 %v1348_v38 }
 0x5b5   :  { %1278 = vmatprep.subr.bf16.mxu0 %v1435_v0 }
 0x5b7   :  { %1259 = vmatpush3.bf16.msra.mxu1 %v1343_v39 }
 0x5b8   :  { %1260 = vmatprep.subr.bf16.mxu1 %v1435_v0 }
 0x5bb   :  { %1261 = vmatpush3.bf16.msra.mxu1 %v1344_v40 }
 0x5bc   :  { %1262 = vmatprep.subr.bf16.mxu1 %v1435_v0 }
 0x5bf   :  { %1263 = vmatpush3.bf16.msra.mxu1 %v1345_v41 }
 0x5c0   :  { %1298 = vmatprep.subr.bf16.mxu1 %v1435_v0 }
 0x675   :  { %v609_v43 = vpop.f32.mrb[8].mxu1 }
 0x676   :  { %v610_v44 = vadd.f32 %v1100_v42, %v609_v43  ;;  %v1246_v45 = vpop.f32.mrb[9].mxu1 }
 0x677   :  { %v612_v46 = vpop.f32.mrb[10].mxu1 }
 0x678   :  { %v613_v47 = vadd.f32 %v1100_v42, %v612_v46  ;;  %v1247_v48 = vpop.f32.mrb[11].mxu1  ;;  %v616_v49 = vmax.f32 %v610_v44, 0.0 }
 0x67a   :  { %v617_v50 = vmax.f32 %v613_v47, 0.0 }
 0x67c   :  { %v618_v51 = vpack.c.bf16 %v617_v50, %v616_v49 }
 0x67e   :  { %1265 = vmatmul.mubr.bf16.vlgmr.msra.gmra.mrb[12].mxu1 %v618_v51 }
 0x67f   :  { %1306 = vmatprep.mubr.msk.bf16.mxu1 %vm1436_vm0, %v1435_v0 }
 0x751   :  { %v706_v53 = vpop.f32.mrb[12].mxu1 }
 0x752   :  { %v707_v54 = vadd.f32 %v1105_v52, %v706_v53  ;;  %v1266_v55 = vpop.f32.mrb[13].mxu1 }
 0x753   :  { %v709_v56 = vpop.f32.mrb[14].mxu1 }
 0x754   :  { %v713_v57 = vadd.f32 %v707_v54, %v546_v31  ;;  %v710_v58 = vadd.f32 %v1105_v52, %v709_v56  ;;  %v1267_v59 = vpop.f32.mrb[15].mxu1 }
 0x755   :  { %v1349_v59 = vld [vmem:[#allocation4 + $0x8] ss:$12 sps:$4 sm:$0xff]  }
 0x756   :  { %v714_v60 = vadd.f32 %v710_v58, %v547_v32  ;;  %v717_v61 = vsel %vm103_vm1, %v713_v57, 0.0  ;;  %v725_v62 = vmul.f32 %v713_v57, %v713_v57 }
 0x757   :  { %718 = vadd.xlane.f32.xlu0 %v717_v61  ;;  %v1350_v61 = vld [vmem:[#allocation4 + $0x20] ss:$12 sps:$4 sm:$0xff]  }
 0x758   :  { %v720_v63 = vsel %vm103_vm1, %v714_v60, 0.0  ;;  %v726_v1 = vmul.f32 %v714_v60, %v714_v60  ;;  %v727_v2 = vsel %vm103_vm1, %v725_v62, 0.0  ;;  %v1351_v62 = vld [vmem:[#allocation4 + $0x38] ss:$12 sps:$4 sm:$0xff]  }
 0x759   :  { %721 = vadd.xlane.f32.xlu1 %v720_v63  ;;  %v1352_v63 = vld [vmem:[#allocation4 + $0x50] ss:$12 sps:$4 sm:$0xff]  }
 0x75a   :  { %v730_v3 = vsel %vm103_vm1, %v726_v1, 0.0  ;;  %v1353_v1 = vld [vmem:[#allocation4 + $0x68] ss:$12 sps:$4 sm:$0xff]  }
 0x75b   :  { %728 = vadd.xlane.f32.xlu0 %v727_v2  ;;  %v1354_v2 = vld [vmem:[#allocation4 + $0x80] ss:$12 sps:$4 sm:$0xff]  }
 0x75d   :  { %731 = vadd.xlane.f32.xlu1 %v730_v3  ;;  %v1355_v3 = vld [vmem:[#allocation4 + $0x98] ss:$12 sps:$4 sm:$0xff]  }
 0x7e4   :  { %v719_v4 = vpop.xlane.xlu0 %718 }
 0x7e5   :  { %v723_v5 = vmul.f32 0.020833334, %v719_v4  ;;  %v1356_v4 = vld [vmem:[#allocation4 + $0xb0] ss:$12 sps:$4 sm:$0xff]  }
 0x7e6   :  { %v722_v6 = vpop.xlane.xlu1 %721 }
 0x7e7   :  { %v724_v7 = vmul.f32 0.020833334, %v722_v6  ;;  %v735_v9 = vmul.f32 %v723_v5, %v723_v5  ;;  %v743_v18 = vsub.f32 %v713_v57, %v723_v5  ;;  %v1357_v5 = vld [vmem:[%s1655_s3] sm:$0xff]   ;;  %v1358_v6 = vld [vmem:[%s1655_s3 + $0x8] sm:$0xff]  }
 0x7e8   :  { %v729_v8 = vpop.xlane.xlu0 %728  ;;  %1299 = vmatpush3.bf16.msra.mxu1 %v1357_v5 }
 0x7e9   :  { %v733_v10 = vmul.f32 0.020833334, %v729_v8  ;;  %v736_v12 = vmul.f32 %v724_v7, %v724_v7  ;;  %v744_v21 = vsub.f32 %v714_v60, %v724_v7  ;;  %1300 = vmatprep.subr.bf16.mxu1 %v1435_v0  ;;  %v1116_v7 = vld [vmem:[%s1656_s4 + $0xe] ss:$0 sm:$0xff] }
 0x7ea   :  { %v732_v11 = vpop.xlane.xlu1 %731 }
 0x7eb   :  { %v737_v13 = vsub.f32 %v733_v10, %v735_v9  ;;  %v734_v14 = vmul.f32 0.020833334, %v732_v11 }
 0x7ec   :  { %1301 = vmatpush3.bf16.msra.mxu1 %v1358_v6 }
 0x7ed   :  { %v739_v15 = vadd.f32 1e-05, %v737_v13  ;;  %v738_v16 = vsub.f32 %v734_v14, %v736_v12  ;;  %1302 = vmatprep.subr.bf16.mxu1 %v1435_v0 }
 0x7ef   :  { %1373 = vrsqrt.f32 %v739_v15  ;;  %v740_v17 = vadd.f32 1e-05, %v738_v16 }
 0x7f1   :  { %1375 = vrsqrt.f32 %v740_v17  ;;  %v1359_v17 = vld [vmem:[%s1655_s3 + $0x10] sm:$0xff]  }
 0x7f2   :  { %1303 = vmatpush3.bf16.msra.mxu1 %v1359_v17 }
 0x7f3   :  { %1304 = vmatprep.subr.bf16.mxu1 %v1435_v0 }
 0x7f9   :  { %v1374_v19 = vpop.eup %1373 }
 0x7fa   :  { %v745_v22 = vmul.f32 %v1374_v19, %v743_v18  ;;  %v1360_v18 = vld [vmem:[%s1655_s3 + $0x18] sm:$0xff]   ;;  %v1121_v19 = vld [vmem:[%s1656_s4 + $0xf] ss:$0 sm:$0xff] }
 0x7fb   :  { %v1376_v23 = vpop.eup %1375  ;;  %1305 = vmatpush3.bf16.msra.mxu1 %v1360_v18 }
 0x7fc   :  { %v751_v25 = vmul.f32 %v1114_v20, %v745_v22  ;;  %v746_v26 = vmul.f32 %v1376_v23, %v744_v21 }
 0x7fe   :  { %v757_v27 = vadd.f32 %v1115_v24, %v751_v25  ;;  %v752_v28 = vmul.f32 %v1114_v20, %v746_v26 }
 0x800   :  { %v759_v29 = vsel %vm103_vm1, %v757_v27, 0.0  ;;  %v758_v30 = vadd.f32 %v1115_v24, %v752_v28  ;;  %v767_v31 = vmul.f32 %v757_v27, %v757_v27 }
 0x801   :  { %760 = vadd.xlane.f32.xlu0 %v759_v29 }
 0x802   :  { %v762_v32 = vsel %vm103_vm1, %v758_v30, 0.0  ;;  %v768_v33 = vmul.f32 %v758_v30, %v758_v30  ;;  %v769_v34 = vsel %vm103_vm1, %v767_v31, 0.0 }
 0x803   :  { %763 = vadd.xlane.f32.xlu1 %v762_v32 }
 0x804   :  { %v772_v35 = vsel %vm103_vm1, %v768_v33, 0.0 }
 0x805   :  { %770 = vadd.xlane.f32.xlu0 %v769_v34 }
 0x807   :  { %773 = vadd.xlane.f32.xlu1 %v772_v35 }
 0x88e   :  { %v761_v39 = vpop.xlane.xlu0 %760 }
 0x88f   :  { %v765_v40 = vmul.f32 0.020833334, %v761_v39 }
 0x890   :  { %v764_v41 = vpop.xlane.xlu1 %763 }
 0x891   :  { %v766_v42 = vmul.f32 0.020833334, %v764_v41  ;;  %v779_v44 = vmul.f32 %v765_v40, %v765_v40  ;;  %v777_v54 = vsub.f32 %v757_v27, %v765_v40 }
 0x892   :  { %v771_v43 = vpop.xlane.xlu0 %770 }
 0x893   :  { %v775_v45 = vmul.f32 0.020833334, %v771_v43  ;;  %v780_v47 = vmul.f32 %v766_v42, %v766_v42  ;;  %v778_v55 = vsub.f32 %v758_v30, %v766_v42 }
 0x894   :  { %v774_v46 = vpop.xlane.xlu1 %773 }
 0x895   :  { %v781_v48 = vsub.f32 %v775_v45, %v779_v44  ;;  %v776_v49 = vmul.f32 0.020833334, %v774_v46 }
 0x897   :  { %v783_v50 = vadd.f32 1e-05, %v781_v48  ;;  %v782_v51 = vsub.f32 %v776_v49, %v780_v47 }
 0x899   :  { %1377 = vrsqrt.f32 %v783_v50  ;;  %v784_v52 = vadd.f32 1e-05, %v782_v51 }
 0x89b   :  { %1379 = vrsqrt.f32 %v784_v52 }
 0x8a3   :  { %v1378_v53 = vpop.eup %1377 }
 0x8a4   :  { %v787_v57 = vmul.f32 %v1378_v53, %v777_v54 }
 0x8a5   :  { %v1380_v56 = vpop.eup %1379 }
 0x8a6   :  { %v788_v58 = vmul.f32 %v1380_v56, %v778_v55 }
 0x8a8   :  { %v811_v60 = vpack.c.bf16 %v788_v58, %v787_v57 }
 0x8aa   :  { %1275 = vmatmul.mubr.msk.bf16.vlgmr.msra.gmra.mrb[8].mxu0 %vm103_vm1, %v811_v60 }
 0x8ab   :  { %1279 = vmatpush3.bf16.msra.mxu0 %v1349_v59  ;;  %1294 = vmatprep.mubr.msk.bf16.mxu0 %vm1436_vm0, %v1435_v0 }
 0x8ac   :  { %1280 = vmatprep.subr.bf16.mxu0 %v1435_v0 }
 0x8af   :  { %1281 = vmatpush3.bf16.msra.mxu0 %v1350_v61 }
 0x8b0   :  { %1282 = vmatprep.subr.bf16.mxu0 %v1435_v0 }
 0x8b3   :  { %1283 = vmatpush3.bf16.msra.mxu0 %v1351_v62 }
 0x8b4   :  { %1284 = vmatprep.subr.bf16.mxu0 %v1435_v0 }
 0x8b7   :  { %1285 = vmatpush3.bf16.msra.mxu0 %v1352_v63 }
 0x8b8   :  { %1286 = vmatprep.subr.bf16.mxu0 %v1435_v0 }
 0x8bb   :  { %1287 = vmatpush3.bf16.msra.mxu0 %v1353_v1 }
 0x8bc   :  { %1288 = vmatprep.subr.bf16.mxu0 %v1435_v0 }
 0x8bf   :  { %1289 = vmatpush3.bf16.msra.mxu0 %v1354_v2 }
 0x8c0   :  { %1290 = vmatprep.subr.bf16.mxu0 %v1435_v0 }
 0x8c3   :  { %1291 = vmatpush3.bf16.msra.mxu0 %v1355_v3 }
 0x8c4   :  { %1292 = vmatprep.subr.bf16.mxu0 %v1435_v0  ;;  %v1130_v0 = vld [vmem:[%s1656_s4 + $0x10] ss:$0 sm:$0xff] }
 0x8c7   :  { %1293 = vmatpush3.bf16.msra.mxu0 %v1356_v4 }
 0x97d   :  { %v872_v8 = vpop.f32.mrb[8].mxu0 }
 0x97e   :  { %v873_v9 = vadd.f32 %v1116_v7, %v872_v8  ;;  %v1276_v10 = vpop.f32.mrb[9].mxu0 }
 0x97f   :  { %v875_v11 = vpop.f32.mrb[10].mxu0 }
 0x980   :  { %v876_v12 = vadd.f32 %v1116_v7, %v875_v11  ;;  %v1277_v13 = vpop.f32.mrb[11].mxu0  ;;  %v879_v14 = vmax.f32 %v873_v9, 0.0 }
 0x982   :  { %v880_v15 = vmax.f32 %v876_v12, 0.0 }
 0x984   :  { %v881_v16 = vpack.c.bf16 %v880_v15, %v879_v14 }
 0x986   :  { %1295 = vmatmul.mubr.bf16.vlgmr.msra.gmra.mrb[12].mxu0 %v881_v16 }
 0xa59   :  { %v969_v20 = vpop.f32.mrb[12].mxu0 }
 0xa5a   :  { %v970_v21 = vadd.f32 %v1121_v19, %v969_v20  ;;  %v1296_v22 = vpop.f32.mrb[13].mxu0 }
 0xa5b   :  { %v972_v23 = vpop.f32.mrb[14].mxu0 }
 0xa5c   :  { %v973_v24 = vadd.f32 %v1121_v19, %v972_v23  ;;  %v1297_v25 = vpop.f32.mrb[15].mxu0  ;;  %v976_v26 = vmax.f32 %v970_v21, 0.0 }
 0xa5e   :  { %v977_v27 = vmax.f32 %v973_v24, 0.0 }
 0xa60   :  { %v986_v28 = vpack.c.bf16 %v977_v27, %v976_v26 }
 0xa62   :  { %1307 = vmatmul.mubr.msk.bf16.vlgmr.msra.gmra.mrb[16].mxu1 %vm1016_vm2, %v986_v28 }
 0xb35   :  { %v1054_v29 = vpop.f32.mrb[16].mxu1 }
 0xb36   :  { %v1055_v30 = vadd.f32 %v1130_v0, %v1054_v29  ;;  %v1308_v31 = vpop.f32.mrb[17].mxu1 }
 0xb37   :  { %v1057_v32 = vpop.f32.mrb[18].mxu1 }
 0xb38   :  { %1062 = vst.msk [vmem:[%s1657_s5] sm:$0xff] %vm1061_vm3, %v1055_v30  ;;  %v1058_v33 = vadd.f32 %v1130_v0, %v1057_v32  ;;  %v1309_v34 = vpop.f32.mrb[19].mxu1 }
 0xb3a   :  { %1063 = vst.msk [vmem:[%s1657_s5 + $0x8] sm:$0xff] %vm1061_vm3, %v1058_v33 }
 0xb3b   :  { %1068 = vsyncpa [#allocation3], 1 }
 0xb3c   :  { %1069 = vsyncpa [#allocation5], 1 }

</bundles_post_ra>
